<compile_context>
chip_gen: v7x
topology: tpu7x:2x2x1
jax: 0.10.0
libtpu: 0.0.40
codegen_flags: <defaults>
</compile_context>

<pallas_src>
import functools

import jax
import jax.numpy as jnp
from jax import lax
from jax.experimental import pallas as pl
from jax.experimental.pallas import tpu as pltpu


LIMIT = 0.01                       # default margin, matches OrdinaryReg.__init__

# VMEM budget for the double-buffered *input* blocks, assuming the worst case
# where Mosaic pads the K-wide minor dim of each block row to 128 lanes (f32).
_VMEM_INPUT_BUDGET = 20 * 1024 * 1024
_VMEM_LIMIT_BYTES = 32 * 1024 * 1024   # >= v5e's 16 MiB default; == v6e/v7x default


def _derive_max_tile_n(k, with_y):
    """Batch tile (rows per grid step) as a function of K.

    Worst-case padded VMEM bytes per block row:
      matrix block: ceil(K/128) * 128 lanes * 4 B   (f32 after in-kernel cast)
      label  block: 128 lanes * 4 B                 (int32, minor dim 1 padded)
    Double-buffered (x2) footprint is kept under _VMEM_INPUT_BUDGET.
    """
    lane_tiles = pl.cdiv(k, 128)
    row_bytes = lane_tiles * 128 * 4
    if with_y:
        row_bytes += 128 * 4
    t = _VMEM_INPUT_BUDGET // (2 * row_bytes)        # 2 = double buffering
    t = max(512, min(int(t), 1 << 16))
    return (t // 512) * 512


def _reg_block(x, y, margin, k):
    """Fused regularizer terms for one (tile_n, K) block.

    x: (T, K) f32, samples on sublanes, classes on lanes.
    y: (T, 1) int32 labels.
    Returns reg: (T, K-1) f32 with reg[i, kk] =
        relu(margin + (x[i,kk] - x[i,kk+1]))   if y[i] >  kk
        relu(margin - (x[i,kk] - x[i,kk+1]))   if y[i] <= kk
    (the two torch masks are complementary for integer y).
    """
    d = x[:, : k - 1] - x[:, 1:k]                       # (T, K-1)
    kk = lax.broadcasted_iota(jnp.int32, d.shape, 1)    # class index on lanes
    sign = jnp.where(y > kk, 1.0, -1.0)                 # fused sign-select
    return jnp.maximum(margin + sign * d, 0.0)


def _store_partial(o_ref, val):
    # One disjoint lane-dense (1, 8, 128) block per grid step: unmasked vst,
    # and disjoint output blocks make the "parallel" grid axis safe.
    o_ref[...] = jnp.full((1, 8, 128), val, jnp.float32)


def _finish(o_ref, reg, *, n_total, tile_n, mask_rows):
    """Reduce the block and store the partial sum; mask tail rows on last tile only."""
    i = pl.program_id(0)
    if mask_rows:                                        # static Python bool
        last = pl.num_programs(0) - 1

        @pl.when(i != last)
        def _():
            _store_partial(o_ref, jnp.sum(reg))

        @pl.when(i == last)
        def _():
            # Reduce over the (small) class axis first, then mask the (T, 1)
            # row sums of the padded tail rows (cheaper than masking (T, K-1)).
            row_sum = jnp.sum(reg, axis=1, keepdims=True)            # (T, 1)
            rows = i * tile_n + lax.broadcasted_iota(
                jnp.int32, (reg.shape[0], 1), 0)
            row_sum = jnp.where(rows < n_total, row_sum, 0.0)        # NaN-safe
            _store_partial(o_ref, jnp.sum(row_sum))
    else:
        _store_partial(o_ref, jnp.sum(reg))


def _kernel_given_y(m_ref, y_ref, o_ref, *, margin, k, n_total, tile_n, mask_rows):
    """Explicit integer labels y, natural (tile_n, 1) layout."""
    x = m_ref[...].astype(jnp.float32)                   # (T, K)
    y = y_ref[...]                                       # (T, 1) int32
    reg = _reg_block(x, y, margin, k)
    _finish(o_ref, reg, n_total=n_total, tile_n=tile_n, mask_rows=mask_rows)


def _kernel_argmax_y(m_ref, o_ref, *, margin, k, n_total, tile_n, mask_rows):
    """y is None in the PyTorch forward -> y = argmax(matrix, dim=1)."""
    x = m_ref[...].astype(jnp.float32)                   # (T, K)
    # First-occurrence argmax over the class (lane) axis; lane reduces ride the
    # XLU, which has slack while the kernel is DMA/VALU bound.
    xmax = jnp.max(x, axis=1, keepdims=True)             # (T, 1)
    cidx = lax.broadcasted_iota(jnp.int32, x.shape, 1)
    y = jnp.min(jnp.where(x == xmax, cidx, k), axis=1, keepdims=True)
    reg = _reg_block(x, y, margin, k)
    _finish(o_ref, reg, n_total=n_total, tile_n=tile_n, mask_rows=mask_rows)


def ordinary_reg(matrix, y=None, limit=LIMIT, max_tile_n=None):
    """JAX/Pallas equivalent of OrdinaryReg(limit).forward(matrix, y).

    matrix: (N, K) float array (f32 or bf16), consumed in its native layout.
    y:      optional (N,) integer labels; if None, argmax over axis 1 is used.
    Returns a scalar float32 loss.
    """
    n, k = matrix.shape
    if k < 2:
        return jnp.zeros((), jnp.float32)   # torch loop is empty -> loss = 0.0

    if max_tile_n is None:
        max_tile_n = _derive_max_tile_n(k, with_y=(y is not None))

    if n <= max_tile_n:
        tile_n = n                                       # full-extent block
    else:
        tile_n = max(8, (int(max_tile_n) // 8) * 8)      # sublane-aligned tile
    grid_n = pl.cdiv(n, tile_n)
    mask_rows = (n % tile_n) != 0                        # tail rows on last tile

    margin = float(limit)                                # Python literal

    m_spec = pl.BlockSpec((tile_n, k), lambda i: (i, 0))
    out_shape = jax.ShapeDtypeStruct((grid_n, 8, 128), jnp.float32)
    out_spec = pl.BlockSpec((1, 8, 128), lambda i: (i, 0, 0))
    # Disjoint per-step output blocks -> the grid axis is truly independent, so
    # it can be sharded across both TensorCores on v7x; near-no-op on v5e/v6e.
    cparams = pltpu.CompilerParams(
        dimension_semantics=("parallel",),
        vmem_limit_bytes=_VMEM_LIMIT_BYTES,
    )

    if y is None:
        partials = pl.pallas_call(
            functools.partial(_kernel_argmax_y, margin=margin, k=k,
                              n_total=n, tile_n=tile_n, mask_rows=mask_rows),
            out_shape=out_shape,
            grid=(grid_n,),
            in_specs=[m_spec],
            out_specs=out_spec,
            compiler_params=cparams,
        )(matrix)
    else:
        y_col = y.reshape(n, 1).astype(jnp.int32)        # free reshape, no copy
        y_spec = pl.BlockSpec((tile_n, 1), lambda i: (i, 0))
        partials = pl.pallas_call(
            functools.partial(_kernel_given_y, margin=margin, k=k,
                              n_total=n, tile_n=tile_n, mask_rows=mask_rows),
            out_shape=out_shape,
            grid=(grid_n,),
            in_specs=[m_spec, y_spec],
            out_specs=out_spec,
            compiler_params=cparams,
        )(matrix, y_col)

    # Each output block holds its partial sum broadcast; element [0, 0] is exact.
    # sum_k mean_n(...) == (sum of all terms) / N.
    return jnp.sum(partials[:, 0, 0]) / n


def _reference(matrix, y=None, limit=LIMIT):
    """Pure-JAX reference mirroring the PyTorch loop, for checking."""
    if y is None:
        y = jnp.argmax(matrix, axis=1)
    K = matrix.shape[1]
    loss = 0.0
    for kk in range(K - 1):
        reg_gt = (y >= kk + 1).astype(jnp.float32) * jax.nn.relu(
            limit + matrix[:, kk] - matrix[:, kk + 1])
        reg_lt = (y <= kk).astype(jnp.float32) * jax.nn.relu(
            limit + matrix[:, kk + 1] - matrix[:, kk])
        loss += jnp.mean(reg_gt + reg_lt)
    return loss


if __name__ == "__main__":
    key = jax.random.PRNGKey(0)
    k1, k2, k3, k4 = jax.random.split(key, 4)

    # Small shape consistent with the module: batch=8 samples, K=16 classes.
    N, K = 8, 16
    matrix = jax.random.normal(k1, (N, K), dtype=jnp.float32)
    y_lbl = jax.random.randint(k2, (N,), 0, K, dtype=jnp.int32)

    loss_none = jax.block_until_ready(ordinary_reg(matrix))
    ref_none = _reference(matrix)
    assert jnp.allclose(loss_none, ref_none, rtol=1e-5, atol=1e-5), (
        loss_none, ref_none)

    loss_y = jax.block_until_ready(ordinary_reg(matrix, y_lbl))
    ref_y = _reference(matrix, y_lbl)
    assert jnp.allclose(loss_y, ref_y, rtol=1e-5, atol=1e-5), (loss_y, ref_y)

    # Second case exercising the tiled grid, the parallel grid axis and the
    # tail-row masking (N=300 is not a multiple of the forced 128-row tile).
    N2, K2 = 300, 12
    matrix2 = jax.random.normal(k3, (N2, K2), dtype=jnp.float32)
    y_lbl2 = jax.random.randint(k4, (N2,), 0, K2, dtype=jnp.int32)

    loss2_none = jax.block_until_ready(ordinary_reg(matrix2, max_tile_n=128))
    ref2_none = _reference(matrix2)
    assert jnp.allclose(loss2_none, ref2_none, rtol=1e-5, atol=1e-5), (
        loss2_none, ref2_none)

    loss2_y = jax.block_until_ready(ordinary_reg(matrix2, y_lbl2, max_tile_n=128))
    ref2_y = _reference(matrix2, y_lbl2)
    assert jnp.allclose(loss2_y, ref2_y, rtol=1e-5, atol=1e-5), (loss2_y, ref2_y)

    # bf16 inputs are passed straight through (half the HBM bytes); the kernel
    # casts to f32 in-register, so it must match the f32 reference on the
    # bf16-rounded values.
    matrix2_bf16 = matrix2.astype(jnp.bfloat16)
    loss_bf16 = jax.block_until_ready(
        ordinary_reg(matrix2_bf16, y_lbl2, max_tile_n=128))
    ref_bf16 = _reference(matrix2_bf16.astype(jnp.float32), y_lbl2)
    assert jnp.allclose(loss_bf16, ref_bf16, rtol=1e-5, atol=1e-5), (
        loss_bf16, ref_bf16)

    print("KERNEL_OK")
</pallas_src>

<mosaic_0001>
module attributes {stable_mosaic.version = 11 : i64} {
  func.func @_kernel_argmax_y(%arg0: i32, %arg1: memref<8x16xf32, #tpu.memory_space<vmem>>, %arg2: memref<1x8x128xf32, #tpu.memory_space<vmem>>) attributes {dimension_semantics = [#tpu.dimension_semantics<parallel>], iteration_bounds = array<i64: 1>, scalar_prefetch = 0 : i64, scratch_operands = 0 : i64, tpu.core_type = #tpu.core_type<tc>, window_params = [{transform_indices = @transform_0, window_bounds = array<i64: 8, 16>}, {transform_indices = @transform_1, window_bounds = array<i64: 1, 8, 128>}]} {
    %c0 = arith.constant 0 : index
    %c0_0 = arith.constant 0 : index
    %0 = vector.load %arg1[%c0, %c0_0] : memref<8x16xf32, #tpu.memory_space<vmem>>, vector<8x16xf32>
    %cst = arith.constant dense<0xFF800000> : vector<8xf32>
    %1 = vector.multi_reduction <maximumf>, %0, %cst [1] : vector<8x16xf32> to vector<8xf32>
    %2 = vector.shape_cast %1 : vector<8xf32> to vector<8x1xf32>
    %3 = tpu.iota {dimensions = array<i32: 1>} : vector<8x16xi32>
    %4 = vector.broadcast %2 : vector<8x1xf32> to vector<8x16xf32>
    %5 = arith.cmpf oeq, %0, %4 : vector<8x16xf32>
    %c16_i32 = arith.constant 16 : i32
    %6 = vector.broadcast %c16_i32 : i32 to vector<8x16xi32>
    %7 = arith.select %5, %3, %6 : vector<8x16xi1>, vector<8x16xi32>
    %cst_1 = arith.constant dense<2147483647> : vector<8xi32>
    %8 = vector.multi_reduction <minsi>, %7, %cst_1 [1] : vector<8x16xi32> to vector<8xi32>
    %9 = vector.shape_cast %8 : vector<8xi32> to vector<8x1xi32>
    %10 = vector.extract_strided_slice %0 {offsets = [0, 0], sizes = [8, 15], strides = [1, 1]} : vector<8x16xf32> to vector<8x15xf32>
    %11 = vector.extract_strided_slice %0 {offsets = [0, 1], sizes = [8, 15], strides = [1, 1]} : vector<8x16xf32> to vector<8x15xf32>
    %12 = arith.subf %10, %11 : vector<8x15xf32>
    %13 = tpu.iota {dimensions = array<i32: 1>} : vector<8x15xi32>
    %14 = vector.broadcast %9 : vector<8x1xi32> to vector<8x15xi32>
    %15 = arith.cmpi sgt, %14, %13 : vector<8x15xi32>
    %cst_2 = arith.constant 1.000000e+00 : f32
    %cst_3 = arith.constant -1.000000e+00 : f32
    %16 = vector.broadcast %cst_2 : f32 to vector<8x15xf32>
    %17 = vector.broadcast %cst_3 : f32 to vector<8x15xf32>
    %18 = arith.select %15, %16, %17 : vector<8x15xi1>, vector<8x15xf32>
    %19 = arith.mulf %18, %12 : vector<8x15xf32>
    %cst_4 = arith.constant 0.00999999977 : f32
    %20 = vector.broadcast %cst_4 : f32 to vector<8x15xf32>
    %21 = arith.addf %20, %19 : vector<8x15xf32>
    %cst_5 = arith.constant 0.000000e+00 : f32
    %22 = vector.broadcast %cst_5 : f32 to vector<8x15xf32>
    %23 = arith.maximumf %21, %22 : vector<8x15xf32>
    %24 = vector.shape_cast %23 : vector<8x15xf32> to vector<1x8x15xf32>
    %cst_6 = arith.constant dense<0.000000e+00> : vector<1xf32>
    %25 = vector.multi_reduction <add>, %24, %cst_6 [1, 2] : vector<1x8x15xf32> to vector<1xf32>
    %26 = vector.shape_cast %25 : vector<1xf32> to vector<1x1x1xf32>
    %27 = vector.extract %26[0, 0, 0] : f32 from vector<1x1x1xf32>
    %28 = vector.broadcast %27 : f32 to vector<1x8x128xf32>
    %c0_7 = arith.constant 0 : index
    %c0_8 = arith.constant 0 : index
    %c0_9 = arith.constant 0 : index
    %29 = vector.load %arg2[%c0_7, %c0_8, %c0_9] : memref<1x8x128xf32, #tpu.memory_space<vmem>>, vector<1x8x128xf32>
    tpu.vector_store %arg2[%c0_7, %c0_8, %c0_9], %28 {strides = array<i32>} : memref<1x8x128xf32, #tpu.memory_space<vmem>>, vector<1x8x128xf32>,
    return
  }
  func.func @transform_0(%arg0: i32) -> (i32, i32) {
    %c0_i32 = arith.constant 0 : i32
    %c0_i32_0 = arith.constant 0 : i32
    return %arg0, %c0_i32 : i32, i32
  }
  func.func @transform_1(%arg0: i32) -> (i32, i32, i32) {
    %c0_i32 = arith.constant 0 : i32
    %c0_i32_0 = arith.constant 0 : i32
    %c0_i32_1 = arith.constant 0 : i32
    return %arg0, %c0_i32, %c0_i32_0 : i32, i32, i32
  }
}

</mosaic_0001>

<bundles_post_ra>
// kernel: tpu_custom_call.1
= control target key start
LH: loop header
LB: loop body
LE: loop exit
PB: predicated region body
PF: predicated region fallthrough
CT: control target
= control target key end

     0   :  { %6 = vsyncpa [#allocation3], 0  ;;  %s175_s0 = inlined_call_operand.hbm [shape: f32[8,16], index: 0, kind: input, shape index: {}]   ;;  %s176_s1 = inlined_call_operand.hbm [shape: f32[1,8,128], index: 1, kind: output, shape index: {}]  }
   0x1   :  { %7 = vsyncpa [#allocation4], 0  ;;  %s137_s6 = smov [#allocation2]   ;;  %s89_s10 = scalar_lea.hbm %s175_s0, 128 }
   0x2   :  { %s14_s7 = sshll.u32 %s137_s6, 4  ;;  %p90_p0 = scmp.ne.s32.totalorder %s175_s0, %s89_s10  ;;  %s15_s7 = int_to_ptr.vmem [resolvable:$true] %s14_s7 }
   0x3   :  { %p93_p1 = scmp.lt.u32.totalorder %s89_s10, %s175_s0 }
   0x5   :  { %p95_p2 = pnand %p93_p1, %p90_p0 }
   0x7   :  { %98 = shalt.err (!%p95_p2)
}
   0x8   :  { %s99_s15 = scalar_lea.vmem %s15_s7, 128  ;;  %p104_p4 = scmp.lt.s32.totalorder %s15_s7, %s15_s7 }
   0x9   :  { %p100_p3 = scmp.ne.s32.totalorder %s15_s7, %s99_s15  ;;  %p105_p5 = scmp.lt.s32.totalorder %s99_s15, %s99_s15 }
   0xb   :  { %p106_p6 = por %p105_p5, %p104_p4 }
   0xd   :  { %p107_p7 = pnand %p106_p6, %p100_p3 }
   0xf   :  { %110 = shalt.err (!%p107_p7)
}
  0x10   :  { %17 = dma.hbm_to_vmem [thread:$0]  %s175_s0, 128, %s15_s7, [#allocation3]  }
  0x11   :  { %133 = dma.done.wait [#allocation3], 128  }
  0x12   :  { %134 = vsyncadd [#allocation3], 4294967168  ;;  %vm22_vm0 = vcmask 130048   ;;  %v21_v0 = vld [vmem:[#allocation2] sm:$0xff]  ;;  %v26_v2 = vlaneseq  ;;  %s138_s0 = smov 127   ;;  %v139_v20 = vmov -1.0  }
  0x13   :  { %v23_v1 = vsel %vm22_vm0, %v21_v0, -inf  ;;  %vm55_vm4 = vcmask 121856   ;;  %s140_s18 = smov [#allocation5]  }
  0x14   :  { %24 = vmax.xlane.f32.xlu0 %v23_v1  ;;  %v27_v3 = vand.u32 127, %v26_v2  ;;  %s74_s19 = sshll.u32 %s140_s18, 4  ;;  %s75_s19 = int_to_ptr.vmem [resolvable:$true] %s74_s19 }
  0x15   :  { %s111_s21 = scalar_lea.vmem %s75_s19, 128  ;;  %p116_p9 = scmp.lt.s32.totalorder %s75_s19, %s75_s19 }
  0x16   :  { %p112_p8 = scmp.ne.s32.totalorder %s75_s19, %s111_s21  ;;  %p117_p10 = scmp.lt.s32.totalorder %s111_s21, %s111_s21 }
  0x18   :  { %p118_p11 = por %p117_p10, %p116_p9 }
  0x1a   :  { %p119_p12 = pnand %p118_p11, %p112_p8 }
  0xa1   :  { %v25_v4 = vpop.xlane.xlu0 %24 }
  0xa2   :  { %vm28_vm1 = vcmp.eq.f32.partialorder %v21_v0, %v25_v4 }
  0xa3   :  { %v29_v5 = vsel %vm28_vm1, %v27_v3, 16 }
  0xa4   :  { %v30_v6 = vsel %vm22_vm0, %v29_v5, 2147483647 }
  0xa5   :  { %v32_v7 = vshra.s32 %v30_v6, 16  ;;  %v31_v9 = vand.u32 65535, %v30_v6 }
  0xa7   :  { %v34_v8 = vcvt.s32.f32 %v32_v7  ;;  %v33_v11 = vcvt.s32.f32 %v31_v9 }
  0xa9   :  { %35 = vmin.xlane.f32.xlu0 %v34_v8 }
 0x136   :  { %v36_v10 = vpop.xlane.xlu0 %35 }
 0x137   :  { %vm37_vm2 = vcmp.eq.f32.partialorder %v34_v8, %v36_v10  ;;  %v42_v13 = vcvt.f32.s32 %v36_v10 }
 0x138   :  { %v38_v12 = vsel %vm37_vm2, %v33_v11, inf }
 0x139   :  { %39 = vmin.xlane.f32.xlu1 %v38_v12  ;;  %v43_v15 = vshll.u32 %v42_v13, 16 }
 0x14a   :  { %46 = vrot.lane.b32.xlu1 %v21_v0, %s138_s0 }
 0x1c6   :  { %v40_v14 = vpop.xlane.xlu1 %39 }
 0x1c7   :  { %v41_v16 = vcvt.f32.s32 %v40_v14 }
 0x1c9   :  { %v44_v17 = vadd.s32 %v43_v15, %v41_v16 }
 0x1ca   :  { %v47_v18 = vpop.permute.xlu1 %46 }
 0x1cb   :  { %vm50_vm3 = vcmp.gt.s32.totalorder %v44_v17, %v27_v3  ;;  %v49_v19 = vsub.f32 %v21_v0, %v47_v18 }
 0x1cc   :  { %v51_v21 = vsel %vm50_vm3, 1.0, %v139_v20 }
 0x1cd   :  { %v52_v22 = vmul.f32 %v51_v21, %v49_v19 }
 0x1cf   :  { %v53_v23 = vadd.f32 0.01, %v52_v22 }
 0x1d1   :  { %v54_v24 = vmax.f32 %v53_v23, 0.0 }
 0x1d3   :  { %v56_v25 = vsel %vm55_vm4, %v54_v24, 0.0 }
 0x1d4   :  { %57 = vadd.xlane.f32.xlu0 %v56_v25 }
 0x261   :  { %v58_v26 = vpop.xlane.xlu0 %57 }
 0x262   :  { %v59_v27 = vrot.slane %v58_v26, 4 }
 0x264   :  { %v60_v28 = vadd.f32 %v59_v27, %v58_v26 }
 0x266   :  { %v61_v29 = vrot.slane %v60_v28, 2 }
 0x268   :  { %v62_v30 = vadd.f32 %v61_v29, %v60_v28 }
 0x26a   :  { %v63_v31 = vrot.slane %v62_v30, 1 }
 0x26c   :  { %v64_v32 = vadd.f32 %v63_v31, %v62_v30 }
 0x26e   :  { %83 = vpush %v64_v32 }
 0x29f   :  { %s84_s20 = spop %83 }
 0x2a0   :  { %v66_v33 = vstv %s84_s20 }
 0x2a1   :  { %67 = vst [vmem:[#allocation5] sm:$0xff] %v66_v33 }
 0x2a2   :  { %122 = shalt.err (!%p119_p12)
}
 0x2a3   :  { %s123_s24 = scalar_lea.hbm %s176_s1, 128 }
 0x2a4   :  { %p124_p13 = scmp.ne.s32.totalorder %s176_s1, %s123_s24  ;;  %p127_p0 = scmp.lt.u32.totalorder %s123_s24, %s176_s1 }
 0x2a6   :  { %p129_p1 = pnand %p127_p0, %p124_p13 }
 0x2a8   :  { %132 = shalt.err (!%p129_p1)
}
 0x2a9   :  { %77 = dma.vmem_to_hbm [thread:$0]  %s75_s19, 128, %s176_s1, [#allocation4]  }
 0x2aa   :  { %135 = dma.done.wait [#allocation4], 128  }
 0x2ab   :  { %136 = vsyncadd [#allocation4], 4294967168 }
 0x2ac   :  { %81 = vsyncpa [#allocation3], 1 }
 0x2ad   :  { %82 = vsyncpa [#allocation4], 1 }

</bundles_post_ra>
